<compile_context>
chip_gen: v5e
topology: v5e:2x2
jax: 0.10.0
libtpu: 0.0.40
codegen_flags: <defaults>
</compile_context>

<pallas_src>
import math
import numpy as np
import jax
import jax.numpy as jnp
from jax.experimental import pallas as pl
from jax.experimental.pallas import tpu as pltpu


# -----------------------------------------------------------------------------
# Pallas kernel
#   out[b, c, p] = sum_k wn[c,k] * amp_b[k] * sin(F_b[k,:] . G[:,p])
#   F_b = [2π*fx, 2π*fy, 2π*phase, 0...],  G = [gx; gy; 1; 0...]
# -----------------------------------------------------------------------------
def _synthesis_input_kernel(f_ref, amp_ref, g_ref, wn_ref, out_ref):
    # f_ref  : (1, C, 8)  per-batch Fourier params (2π folded in the wrapper)
    # amp_ref: (1, 1, C)  per-batch per-channel amplitude
    # g_ref  : (8, TS)    spatial-coordinate rows [gx, gy, 1, 0, ...]
    # wn_ref : (C, C)     weights / sqrt(C)  (shared across the grid)
    # out_ref: (1, C, TS) NCHW output tile (spatial flattened, lane-dense)

    # Fourier argument on the MXU (tiny K=8 matmul, kept in f32 for phase precision).
    arg = jnp.dot(f_ref[0], g_ref[...], preferred_element_type=jnp.float32)   # (C, TS)
    x = jnp.sin(arg)                                                          # (C, TS)

    # Fold the per-channel amplitude into the (C, C) weight: O(C^2), not O(C*TS).
    wn_b = wn_ref[...] * amp_ref[0]                                           # (C, C)

    # Channel mixing: one MXU matmul, bf16 inputs + f32 accumulation.
    y = jnp.dot(wn_b.astype(jnp.bfloat16), x.astype(jnp.bfloat16),
                preferred_element_type=jnp.float32)                           # (C, TS)
    out_ref[0] = y.astype(out_ref.dtype)


# -----------------------------------------------------------------------------
# Generation-aware VMEM budgeting / spatial tile selection
# -----------------------------------------------------------------------------
def _vmem_budget_and_limit():
    try:
        cap = int(pltpu.get_tpu_info().vmem_capacity_bytes)
    except Exception:
        cap = 64 * 1024 * 1024                       # conservative (v7x per-TC VMEM)
    budget = cap // 2                                # 32 MiB on v7x, 64 MiB on v5e/v6e
    limit = min(cap - (16 << 20), budget + (8 << 20))   # 40 MiB v7x, 72 MiB v5e/v6e
    limit = max(limit, 16 << 20)
    return budget, limit


def _choose_spatial_tile(hw, channels, batch, vmem_budget, itemsize=4):
    C = channels
    # Fixed VMEM overhead (independent of the spatial tile):
    #   weights double-buffered + params tile padded to 128 lanes + amp tile + 1 MiB slack.
    fixed = (2 * C * C + 2 * C * 128 + 2 * 8 * 128) * itemsize + (1 << 20)
    # Per spatial element: out block x2 buffers (C f32), G rows x2 buffers (8 f32),
    # arg + sin + f32 matmul result (3C f32), bf16 copy of sin (C bf16).
    per_elem = (2 * C + 2 * 8 + 3 * C) * itemsize + 2 * C
    avail = max(vmem_budget - fixed, 128 * per_elem)
    ts_max = max(128, (avail // per_elem) // 128 * 128)

    if hw <= ts_max:
        ts = hw
    elif hw % 128 == 0:
        # Largest multiple of 128 <= ts_max that divides hw: lane-dense unmasked
        # stores and no ragged last tile.
        ts = 128
        for cand in range(ts_max // 128, 0, -1):
            if hw % (cand * 128) == 0:
                ts = cand * 128
                break
    else:
        ts = ts_max   # ragged last tile: correct (masked stores on the final block only)

    # v7x has 2 TensorCores sharded over the "parallel" axes: guarantee >=2 programs.
    if batch * pl.cdiv(hw, ts) < 2 and hw % 256 == 0:
        ts = hw // 2
    return int(ts)


def synthesis_input_pallas(params, amps, grid_g, weight_n, *, spatial_tile=None):
    """params: [B,C,8], amps: [B,1,C], grid_g: [8,H*W], weight_n: [C,C] -> [B,C,H*W] f32."""
    B, C, _ = params.shape
    HW = grid_g.shape[1]
    budget, vmem_limit = _vmem_budget_and_limit()
    ts = _choose_spatial_tile(HW, C, B, budget) if spatial_tile is None else int(spatial_tile)
    n_t = pl.cdiv(HW, ts)

    cost = pl.CostEstimate(
        flops=2 * B * C * C * HW + 2 * B * C * 8 * HW,
        transcendentals=B * C * HW,
        bytes_accessed=4 * (B * C * HW + C * C + 8 * HW + B * C * 8 + B * C),
    )

    return pl.pallas_call(
        _synthesis_input_kernel,
        out_shape=jax.ShapeDtypeStruct((B, C, HW), jnp.float32),
        grid_spec=pltpu.PrefetchScalarGridSpec(
            num_scalar_prefetch=0,
            grid=(B, n_t),
            in_specs=[
                pl.BlockSpec((1, C, 8), lambda b, t: (b, 0, 0)),   # per-batch Fourier params
                pl.BlockSpec((1, 1, C), lambda b, t: (b, 0, 0)),   # per-batch amplitudes
                pl.BlockSpec((8, ts), lambda b, t: (0, t)),        # spatial coordinate rows
                pl.BlockSpec((C, C), lambda b, t: (0, 0)),         # shared weights
            ],
            out_specs=pl.BlockSpec((1, C, ts), lambda b, t: (b, 0, t)),
        ),
        compiler_params=pltpu.CompilerParams(
            dimension_semantics=("parallel", "parallel"),
            vmem_limit_bytes=vmem_limit,
        ),
        cost_estimate=cost,
    )(params, amps, grid_g, weight_n)


# -----------------------------------------------------------------------------
# Module: parameter/buffer setup + per-batch affine glue (plain JAX, O(B*C)),
# Pallas kernel on the H*W*C hot path.
# -----------------------------------------------------------------------------
class SynthesisInputPallas:
    def __init__(self, w_dim, channels, size, sampling_rate, bandwidth, key):
        self.w_dim = w_dim
        self.channels = channels
        self.size = np.broadcast_to(size, [2])
        self.sampling_rate = float(sampling_rate)
        self.bandwidth = float(bandwidth)

        k1, k2, k3, k4 = jax.random.split(key, 4)
        # buffers (same construction as the torch module, jax RNG here)
        freqs = jax.random.uniform(k1, (channels, 2), dtype=jnp.float32)
        radii = jnp.sqrt(jnp.sum(freqs ** 2, axis=1, keepdims=True))
        freqs = freqs / (radii * jnp.power(jnp.exp(radii ** 2), 0.25))
        freqs = freqs * self.bandwidth
        phases = jax.random.uniform(k2, (channels,), dtype=jnp.float32) - 0.5
        self.freqs = freqs                     # [C, 2]
        self.phases = phases                   # [C]

        # learned channel-mixing weight [C, C]
        self.weights = jax.random.normal(k3, (channels, channels), dtype=jnp.float32)

        # affine FC: w_dim -> 4 (weight_init=0 in the original; small deterministic
        # random init here so the rotation/translation path is exercised)
        self.affine_w = 0.1 * jax.random.normal(k4, (4, w_dim), dtype=jnp.float32)
        self.affine_b = jnp.array([1.0, 0.0, 0.0, 0.0], dtype=jnp.float32)

        # precomputed flattened affine_grid coordinates as MXU-ready rows:
        #   G = [gx; gy; 1; 0; 0; 0; 0; 0]  of shape [8, H*W]
        H, W = int(self.size[1]), int(self.size[0])
        sx = 0.5 * self.size[0] / self.sampling_rate
        sy = 0.5 * self.size[1] / self.sampling_rate
        jj = jnp.arange(W, dtype=jnp.float32)
        ii = jnp.arange(H, dtype=jnp.float32)
        gx_row = sx * (-1.0 + (2.0 * jj + 1.0) / W)              # [W]
        gy_col = sy * (-1.0 + (2.0 * ii + 1.0) / H)              # [H]
        gx_flat = jnp.broadcast_to(gx_row[None, :], (H, W)).reshape(-1)
        gy_flat = jnp.broadcast_to(gy_col[:, None], (H, W)).reshape(-1)
        ones = jnp.ones((H * W,), jnp.float32)
        zeros = jnp.zeros((H * W,), jnp.float32)
        self.grid_g = jnp.stack([gx_flat, gy_flat, ones,
                                 zeros, zeros, zeros, zeros, zeros], axis=0)  # [8, H*W]

    def _per_batch_params(self, w):
        # t = affine(w), then normalize by norm of first two components
        t = w @ self.affine_w.T + self.affine_b                    # [B, 4]
        t = t / jnp.linalg.norm(t[:, :2], axis=1, keepdims=True)   # [B, 4]
        c, s, tx, ty = t[:, 0], t[:, 1], t[:, 2], t[:, 3]

        # transforms = m_r @ m_t (only the 2x3 part is ever used)
        t0 = -c * tx + s * ty
        t1 = -s * tx - c * ty
        R = jnp.stack([jnp.stack([c, -s], axis=-1),
                       jnp.stack([s, c], axis=-1)], axis=-2)        # [B, 2, 2]
        tv = jnp.stack([t0, t1], axis=-1)                           # [B, 2]

        phases_b = self.phases[None, :] + jnp.einsum('cd,bd->bc', self.freqs, tv)
        freqs_b = jnp.einsum('cd,bde->bce', self.freqs, R)          # [B, C, 2]
        amps = jnp.clip(
            1.0 - (jnp.linalg.norm(freqs_b, axis=2) - self.bandwidth)
            / (self.sampling_rate / 2.0 - self.bandwidth), 0.0, 1.0)
        return freqs_b, phases_b, amps

    def __call__(self, w):
        B = w.shape[0]
        H, W = int(self.size[1]), int(self.size[0])

        freqs_b, phases_b, amps = self._per_batch_params(w)
        two_pi = jnp.float32(2.0 * np.pi)
        zeros = jnp.zeros_like(phases_b)
        # packed per-batch params [B, C, 8]: [2π*fx, 2π*fy, 2π*phase, 0...]
        params = jnp.stack([freqs_b[..., 0] * two_pi,
                            freqs_b[..., 1] * two_pi,
                            phases_b * two_pi,
                            zeros, zeros, zeros, zeros, zeros],
                           axis=-1).astype(jnp.float32)             # [B, C, 8]
        amps3 = amps[:, None, :].astype(jnp.float32)                # [B, 1, C]

        weight_n = (self.weights / math.sqrt(self.channels)).astype(jnp.float32)  # [C, C]

        out_flat = synthesis_input_pallas(params, amps3, self.grid_g, weight_n)   # [B,C,H*W]
        # row-major reshape to NCHW -- a free view, no extra HBM traffic.
        return out_flat.reshape(B, self.channels, H, W)

    # pure-JAX f32 reference of the same forward (for verification)
    def reference(self, w):
        H, W = int(self.size[1]), int(self.size[0])
        sx = 0.5 * self.size[0] / self.sampling_rate
        sy = 0.5 * self.size[1] / self.sampling_rate
        freqs_b, phases_b, amps = self._per_batch_params(w)
        jj = jnp.arange(W, dtype=jnp.float32)
        ii = jnp.arange(H, dtype=jnp.float32)
        gx = sx * (-1.0 + (2.0 * jj + 1.0) / W)          # [W]
        gy = sy * (-1.0 + (2.0 * ii + 1.0) / H)          # [H]
        x = (gx[None, None, :, None] * freqs_b[:, None, None, :, 0]
             + gy[None, :, None, None] * freqs_b[:, None, None, :, 1]
             + phases_b[:, None, None, :])
        x = jnp.sin(x * (2.0 * np.pi)) * amps[:, None, None, :]
        weight = self.weights / math.sqrt(self.channels)
        x = x @ weight.T
        return jnp.transpose(x, (0, 3, 1, 2))


if __name__ == "__main__":
    key = jax.random.PRNGKey(0)
    k_params, k_w = jax.random.split(key)

    # small shapes consistent with the module
    B, W_DIM, CHANNELS, SIZE = 2, 32, 8, 16
    SAMPLING_RATE, BANDWIDTH = 16, 2

    mod = SynthesisInputPallas(w_dim=W_DIM, channels=CHANNELS, size=SIZE,
                               sampling_rate=SAMPLING_RATE, bandwidth=BANDWIDTH,
                               key=k_params)
    w = jax.random.normal(k_w, (B, W_DIM), dtype=jnp.float32)

    out = mod(w)
    out = jax.block_until_ready(out)
    assert out.shape == (B, CHANNELS, SIZE, SIZE), out.shape

    ref = jax.block_until_ready(mod.reference(w))
    # Tolerance relaxed vs the pure-f32 version: the channel-mix matmul now runs
    # with bf16 inputs (f32 accumulation) per the performance review.
    np.testing.assert_allclose(np.asarray(out), np.asarray(ref),
                               rtol=3e-2, atol=3e-2)
    print("KERNEL_OK")
</pallas_src>

<mosaic_0001>
module attributes {stable_mosaic.version = 11 : i64} {
  func.func @_synthesis_input_kernel(%arg0: i32, %arg1: i32, %arg2: memref<1x8x8xf32, #tpu.memory_space<vmem>>, %arg3: memref<1x1x8xf32, #tpu.memory_space<vmem>>, %arg4: memref<8x256xf32, #tpu.memory_space<vmem>>, %arg5: memref<8x8xf32, #tpu.memory_space<vmem>>, %arg6: memref<1x8x256xf32, #tpu.memory_space<vmem>>) attributes {dimension_semantics = [#tpu.dimension_semantics<parallel>, #tpu.dimension_semantics<parallel>], iteration_bounds = array<i64: 2, 1>, scalar_prefetch = 0 : i64, scratch_operands = 0 : i64, tpu.core_type = #tpu.core_type<tc>, window_params = [{transform_indices = @transform_0, window_bounds = array<i64: 1, 8, 8>}, {transform_indices = @transform_1, window_bounds = array<i64: 1, 1, 8>}, {transform_indices = @transform_2, window_bounds = array<i64: 8, 256>}, {pipeline_mode = #tpu.pipeline_mode<synchronous>, transform_indices = @transform_3, window_bounds = array<i64: 8, 8>}, {transform_indices = @transform_4, window_bounds = array<i64: 1, 8, 256>}]} {
    %c0 = arith.constant 0 : index
    %c0_0 = arith.constant 0 : index
    %c0_1 = arith.constant 0 : index
    %0 = vector.load %arg2[%c0, %c0_0, %c0_1] : memref<1x8x8xf32, #tpu.memory_space<vmem>>, vector<1x8x8xf32>
    %1 = vector.shape_cast %0 : vector<1x8x8xf32> to vector<8x8xf32>
    %c0_2 = arith.constant 0 : index
    %c0_3 = arith.constant 0 : index
    %2 = vector.load %arg4[%c0_2, %c0_3] : memref<8x256xf32, #tpu.memory_space<vmem>>, vector<8x256xf32>
    %cst = arith.constant dense<0.000000e+00> : vector<8x256xf32>
    %3 = tpu.matmul %1, %2, %cst {dimension_numbers = #tpu.dot_dimension_numbers<[1], [0], [0], [1], [0, 0, 1, 1], [], []>} : vector<8x8xf32>, vector<8x256xf32>, vector<8x256xf32> -> vector<8x256xf32>
    %4 = math.sin %3 : vector<8x256xf32>
    %c0_4 = arith.constant 0 : index
    %c0_5 = arith.constant 0 : index
    %5 = vector.load %arg5[%c0_4, %c0_5] : memref<8x8xf32, #tpu.memory_space<vmem>>, vector<8x8xf32>
    %c0_6 = arith.constant 0 : index
    %c0_7 = arith.constant 0 : index
    %c0_8 = arith.constant 0 : index
    %6 = vector.load %arg3[%c0_6, %c0_7, %c0_8] : memref<1x1x8xf32, #tpu.memory_space<vmem>>, vector<1x1x8xf32>
    %7 = vector.shape_cast %6 : vector<1x1x8xf32> to vector<1x8xf32>
    %8 = vector.broadcast %7 : vector<1x8xf32> to vector<8x8xf32>
    %9 = arith.mulf %5, %8 : vector<8x8xf32>
    %10 = arith.truncf %9 : vector<8x8xf32> to vector<8x8xbf16>
    %11 = arith.truncf %4 : vector<8x256xf32> to vector<8x256xbf16>
    %cst_9 = arith.constant dense<0.000000e+00> : vector<8x256xf32>
    %12 = tpu.matmul %10, %11, %cst_9 {dimension_numbers = #tpu.dot_dimension_numbers<[1], [0], [0], [1], [0, 0, 1, 1], [], []>} : vector<8x8xbf16>, vector<8x256xbf16>, vector<8x256xf32> -> vector<8x256xf32>
    %c0_10 = arith.constant 0 : index
    %c0_11 = arith.constant 0 : index
    %c0_12 = arith.constant 0 : index
    %13 = vector.load %arg6[%c0_10, %c0_11, %c0_12] : memref<1x8x256xf32, #tpu.memory_space<vmem>>, vector<1x8x256xf32>
    %14 = vector.shape_cast %13 : vector<1x8x256xf32> to vector<8x256xf32>
    %15 = vector.shape_cast %12 : vector<8x256xf32> to vector<1x8x256xf32>
    tpu.vector_store %arg6[%c0_10, %c0_11, %c0_12], %15 {strides = array<i32>} : memref<1x8x256xf32, #tpu.memory_space<vmem>>, vector<1x8x256xf32>,
    return
  }
  func.func @transform_0(%arg0: i32, %arg1: i32) -> (i32, i32, i32) {
    %c0_i32 = arith.constant 0 : i32
    %c0_i32_0 = arith.constant 0 : i32
    %c0_i32_1 = arith.constant 0 : i32
    return %arg0, %c0_i32, %c0_i32_0 : i32, i32, i32
  }
  func.func @transform_1(%arg0: i32, %arg1: i32) -> (i32, i32, i32) {
    %c0_i32 = arith.constant 0 : i32
    %c0_i32_0 = arith.constant 0 : i32
    %c0_i32_1 = arith.constant 0 : i32
    return %arg0, %c0_i32, %c0_i32_0 : i32, i32, i32
  }
  func.func @transform_2(%arg0: i32, %arg1: i32) -> (i32, i32) {
    %c0_i32 = arith.constant 0 : i32
    %c0_i32_0 = arith.constant 0 : i32
    return %c0_i32, %arg1 : i32, i32
  }
  func.func @transform_3(%arg0: i32, %arg1: i32) -> (i32, i32) {
    %c0_i32 = arith.constant 0 : i32
    %c0_i32_0 = arith.constant 0 : i32
    %c0_i32_1 = arith.constant 0 : i32
    return %c0_i32, %c0_i32_0 : i32, i32
  }
  func.func @transform_4(%arg0: i32, %arg1: i32) -> (i32, i32, i32) {
    %c0_i32 = arith.constant 0 : i32
    %c0_i32_0 = arith.constant 0 : i32
    return %arg0, %c0_i32, %arg1 : i32, i32, i32
  }
}

</mosaic_0001>

<bundles_post_ra>
// kernel: tpu_custom_call.1
= control target key start
LH: loop header
LB: loop body
LE: loop exit
PB: predicated region body
PF: predicated region fallthrough
CT: control target
= control target key end

     0   :  { %s1579_s0 = inlined_call_operand.hbm [shape: f32[2,8,8], index: 0, kind: input, shape index: {}]   ;;  %s1580_s1 = inlined_call_operand.hbm [shape: f32[2,1,8], index: 1, kind: input, shape index: {}]   ;;  %s1581_s2 = inlined_call_operand.hbm [shape: f32[8,256], index: 2, kind: input, shape index: {}]   ;;  %s1582_s3 = inlined_call_operand.hbm [shape: f32[8,8], index: 3, kind: input, shape index: {}]   ;;  %s1583_s4 = inlined_call_operand.hbm [shape: f32[2,8,256], index: 4, kind: output, shape index: {}]  }
   0x1   :  { %1586 = sst [smem:[#allocation19_spill]] %s1581_s2 }
   0x2   :  { %1587 = sst [smem:[#allocation20_spill]] %s1582_s3 }
   0x3   :  { %9 = vsyncpa [#allocation3], 0 }
   0x4   :  { %11 = vsyncpa [#allocation3 + $0x1], 0 }
   0x5   :  { %12 = vsyncpa [#allocation6], 0 }
   0x6   :  { %14 = vsyncpa [#allocation6 + $0x1], 0 }
   0x7   :  { %15 = vsyncpa [#allocation9], 0 }
   0x8   :  { %16 = vsyncpa [#allocation4], 0 }
   0x9   :  { %18 = vsyncpa [#allocation4 + $0x1], 0  ;;  %s1223_s15 = smov 0   ;;  %s1225_s16 = smov 0  }
   0xa   :  { %s1227_s17 = smov 0   ;;  %s1229_s18 = smov 0  }
   0xb   :  { %s1231_s19 = smov 0   ;;  %s1233_s20 = smov 0  }
   0xc LB: > { %1588 = sst [smem:[#allocation16_spill]] %s1175_s17  ;;  %s1254_s21 = sadd.s32 4294967295, %s1187_s20   ;;  %s1187_s20 = sphi %s1233_s20, %s24_s20   ;;  %s1183_s19 = sphi %s1231_s19, %s1608_s19   ;;  %s1179_s18 = sphi %s1229_s18, %s1607_s18   ;;  %s1175_s17 = sphi %s1227_s17, %s1603_s17   ;;  %s1171_s16 = sphi %s1225_s16, %s1606_s16   ;;  %s1167_s15 = sphi %s1223_s15, %s1605_s15  }
   0xd   : > { %s849_s22 = sadd.s32 4294967294, %s1187_s20   ;;  %p56_p0 = scmp.ne.s32.totalorder %s1171_s16, %s1167_s15 }
   0xe   : > { %p57_p1 = scmp.eq.s32.totalorder %s1254_s21, 0  ;;  %p155_p2 = scmp.eq.s32.totalorder %s1254_s21, 1 }
   0xf   : > { %p161_p3 = scmp.eq.s32.totalorder %s849_s22, 1  ;;  %p850_p5 = scmp.ge.s32.totalorder %s1187_s20, 1 }
  0x10   : > { %p1263_p4 = por %p57_p1, %p56_p0  ;;  %p168_p7 = scmp.lt.s32.totalorder %s1187_s20, 3 }
  0x11   : > { %p1268_p6 = por %p161_p3, %p56_p0  ;;  %s1591_s2 = sld [smem:[#allocation19_spill]] }
  0x12   : > { %p1276_p8 = pnand %p850_p5, %p168_p7  ;;  %p853_p9 = scmp.ge.s32.totalorder %s1187_s20, 2 }
  0x13   : > { %s1189_s29 = smov [#allocation7]   ;;  %s1593_s3 = sld [smem:[#allocation20_spill]] }
  0x14   : > { %p891_p10 = pneg %p1276_p8  ;;  %s185_s30 = sshll.u32 %s1189_s29, 4  ;;  %s186_s30 = int_to_ptr.vmem [resolvable:$true] %s185_s30 }
  0x15   : > { %s1190_s8 = smov [#allocation8]   ;;  %s36_s10 = sadd.s32 1, %s1183_s19 }
  0x16   : > { %p892_p11 = pnand %p891_p10, %p57_p1  ;;  %s197_s9 = sshll.u32 %s1190_s8, 4  ;;  %s198_s9 = int_to_ptr.vmem [resolvable:$true] %s197_s9 }
  0x17   : > { %s183_s27 = sshll.u32 %s1591_s2, 4  ;;  %s43_s11 = sadd.s32 1, %s1175_s17  ;;  %s184_s27 = int_to_ptr.hbm [resolvable:$true] %s183_s27 }
  0x18   : > { %894 = dma.hbm_to_vmem [thread:$0]  (!%p892_p11), %s184_s27, 256, %s186_s30, [#allocation6]  }
  0x19   : > { %s195_s7 = sshll.u32 %s1593_s3, 4  ;;  %p38_p12 = scmp.ge.s32.totalorder %s36_s10, 2  ;;  %s196_s7 = int_to_ptr.hbm [resolvable:$true] %s195_s7 }
  0x1a   : > { %897 = dma.hbm_to_vmem [thread:$0]  (!%p892_p11), %s196_s7, 128, %s198_s9, [#allocation9]  }
  0x1b   : > { %p50_p13 = scmp.ne.s32.totalorder %s1175_s17, %s1171_s16  ;;  %p51_p0 = scmp.eq.s32.totalorder %s1187_s20, 0 }
  0x1c   : > { %p911_p3 = scmp.lt.s32.totalorder %s1187_s20, 2  ;;  %s1610_s10 = smov (%p38_p12, %s36_s10), 0 }
  0x1d   : > { %1594 = sst [smem:[#allocation17_spill]] %s1610_s10  ;;  %p1296_p5 = por %p51_p0, %p50_p13 }
  0x1e   : > { %p1302_p7 = por %p155_p2, %p50_p13  ;;  %s40_s14 = ssub.s32 %s1183_s19, %s1610_s10 }
  0x1f   : > { %s208_s22 = sand.u32 1, %s1175_s17   ;;  %p41_p10 = scmp.eq.s32.totalorder %s40_s14, 0 }
  0x20   : > { %s854_s25 = sshll.u32 %s208_s22, 3  ;;  %s855_s26 = sshll.u32 %s1183_s19, 3 }
  0x21   : > { %s1311_s27 = scalar_select %p41_p10, %s1175_s17, %s43_s11  }
  0x22   : > { %s216_s5 = scalar_lea.hbm %s1579_s0, %s855_s26  ;;  %s212_s7 = scalar_lea.vmem [#allocation2], %s854_s25 }
  0x23   : > { %1597 = sst [smem:[#allocation18_spill]] %s1311_s27  ;;  %s218_s6 = sshll.u32 %s216_s5, 4  ;;  %s219_s6 = int_to_ptr.hbm [resolvable:$true] %s218_s6 }
  0x24   : > { %s220_s8 = sshll.u32 %s212_s7, 4  ;;  %p899_p2 = pnand %p911_p3, %p1296_p5  ;;  %s221_s8 = int_to_ptr.vmem [resolvable:$true] %s220_s8 }
  0x25   : > { %s227_s9 = sand.u32 1, %s1187_s20   ;;  %s233_s14 = scalar_lea.hbm %s1580_s1, %s1183_s19 }
  0x26   : > { %s209_s10 = scalar_lea.sflag [#allocation3], %s208_s22  ;;  %s235_s11 = sshll.u32 %s233_s14, 4  ;;  %s236_s11 = int_to_ptr.hbm [resolvable:$true] %s235_s11 }
  0x27   : > { %901 = dma.hbm_to_vmem [thread:$0]  (!%p899_p2), %s219_s6, 128, %s221_s8, %s209_s10  }
  0x28   : > { %s230_s27 = scalar_lea.vmem [#allocation5], %s208_s22  ;;  %s228_s26 = scalar_lea.sflag [#allocation6], %s227_s9 }
  0x29   : > { %s237_s17 = sshll.u32 %s230_s27, 4  ;;  %246 = sbr.rel (%p1276_p8) target bundleno = 441 (0x1b9), region = 36  ;;  %s238_s17 = int_to_ptr.vmem [resolvable:$true] %s237_s17 }
  0x2a   : > { %904 = dma.hbm_to_vmem [thread:$0]  (!%p899_p2), %s236_s11, 16, %s238_s17, %s228_s26  }
  0x2b   : > { %s1328_s12 = sand.u32 (!%p1276_p8), 1, %s1171_s16  }
  0x2c   : > { %s857_s2 = sshll.u32 (!%p1276_p8), %s1328_s12, 3  ;;  %s249_s3 = scalar_lea.sflag (!%p1276_p8), [#allocation3], %s1328_s12 }
  0x2d   : > { %s252_s25 = scalar_lea.vmem (!%p1276_p8), [#allocation2], %s857_s2 }
  0x2e   : > { %1146 = dma.done.wait (%p1263_p4), %s249_s3, 128  }
  0x2f   : > { %1148 = vsyncadd (%p1263_p4), %s249_s3, 4294967168  ;;  %s258_s17 = sand.u32 1, %s1254_s21   ;;  %s261_s10 = scalar_lea.vmem [#allocation5], %s1328_s12 }
  0x30   : > { %s259_s28 = scalar_lea.sflag [#allocation6], %s258_s17 }
  0x31   : > { %1150 = dma.done.wait (%p1263_p4), %s259_s28, 16  }
  0x32   : > { %1152 = vsyncadd (%p1263_p4), %s259_s28, 4294967280 }
  0x33   : > { %1154 = dma.done.wait (%p57_p1), [#allocation6], 256  }
  0x34   : > { %1156 = vsyncadd (%p57_p1), [#allocation6], 4294967040 }
  0x35   : > { %1158 = dma.done.wait (%p57_p1), [#allocation9], 128  }
  0x36   : > { %1160 = vsyncadd (%p57_p1), [#allocation9], 4294967168  ;;  %vm307_vm0 = vcmask 64512   ;;  %v305_v0 = vld [vmem:[#allocation7] sm:$0xff]  ;;  %v306_v1 = vld [vmem:[#allocation7 + $0x8] sm:$0xff]  ;;  %s860_s21 = sshll.u32 %s1328_s12, 4 }
  0x37   : > { %v304_v2 = vld [vmem:[%s252_s25] sm:$0xff]  ;;  %326 = vmatpush.msra.mxu0 %v305_v0  ;;  %346 = vmatpush.msra.mxu1 %v306_v1  ;;  %v1191_v28 = vmov 683565275   ;;  %v1192_v30 = vmov 2475754826   ;;  %s300_s23 = scalar_lea.vmem [#allocation10], %s860_s21 }
  0x38   : > { %861 = vmatmul.msk.f32.vlgmr.msra.gmra.mxu0 %vm307_vm0, %v304_v2  ;;  %862 = vmatmul.msk.f32.vlgmr.msra.gmra.mxu1 %vm307_vm0, %v304_v2  ;;  %v1193_v34 = vmov 2131351028   ;;  %v1194_v37 = vmov 2102212464   ;;  %v1195_v40 = vmov 920167782  }
  0x39   : > { %v1196_v43 = vmov 1326507024   ;;  %s876_s22 = sshll.u32 %s1179_s18, 4  ;;  %s724_s5 = sshll.u32 %s300_s23, 4  ;;  %s725_s5 = int_to_ptr.vmem [resolvable:$true] %s724_s5 }
  0x3a   : > { %s722_s30 = scalar_lea.hbm %s1583_s4, %s876_s22  ;;  %s709_s7 = scalar_lea.sflag [#allocation4], %s1328_s12 }
  0x3b   : > { %s726_s6 = sshll.u32 %s722_s30, 4  ;;  %s1113_s11 = scalar_lea.hbm %s1583_s4, 32  ;;  %s727_s6 = int_to_ptr.hbm [resolvable:$true] %s726_s6 }
  0x3c   : > { %s1107_s8 = sshra.s32 %s727_s6, 4  ;;  %s1108_s8 = int_to_ptr.hbm [resolvable:$true] %s1107_s8 }
  0x3d   : > { %s1109_s9 = scalar_lea.hbm %s1108_s8, 16  ;;  %p1114_p11 = scmp.lt.s32.totalorder %s1108_s8, %s1583_s4 }
  0x3e   : > { %p1110_p1 = scmp.ne.s32.totalorder %s1108_s8, %s1109_s9  ;;  %p1115_p12 = scmp.lt.s32.totalorder %s1113_s11, %s1109_s9 }
  0x40   : > { %p1111_p4 = pnand %p1110_p1, %p1302_p7  ;;  %p1116_p13 = por %p1115_p12, %p1114_p11 }
  0x42   : > { %p1112_p8 = pneg %p1111_p4 }
  0x44   : > { %p1117_p0 = pnand %p1116_p13, %p1112_p8 }
  0xb5   : > { %v1352_v3 = vpop.f32.mrf.mxu0  ;;  %v1354_v4 = vpop.f32.mrf.mxu1 }
  0xb6   : > { %v351_v5 = vand.u32 2147483647, %v1352_v3  ;;  %v354_v6 = vand.u32 2139095040, %v1352_v3  ;;  %v506_v7 = vand.u32 2147483647, %v1354_v4  ;;  %v509_v8 = vand.u32 2139095040, %v1354_v4 }
  0xb8   : > { %v355_v9 = vshrl.u32 %v354_v6, 23  ;;  %v358_v10 = vand.u32 8388607, %v351_v5  ;;  %v510_v11 = vshrl.u32 %v509_v8, 23  ;;  %v513_v14 = vand.u32 8388607, %v506_v7 }
  0xba   : > { %v863_v12 = vadd.s32 4294967169, %v355_v9  ;;  %v359_v13 = vor.u32 8388608, %v358_v10  ;;  %v866_v15 = vadd.s32 4294967169, %v510_v11  ;;  %v514_v19 = vor.u32 8388608, %v513_v14 }
  0xbc   : > { %v361_v16 = vadd.s32 1, %v863_v12  ;;  %v516_v17 = vadd.s32 1, %v866_v15  ;;  %v1364_v18 = vshll.u32 %v359_v13, 8  ;;  %v1371_v26 = vshll.u32 %v514_v19, 8 }
  0xbe   : > { %vm362_vm1 = vcmp.gt.s32.totalorder %v361_v16, 0  ;;  %vm517_vm2 = vcmp.gt.s32.totalorder %v516_v17, 0  ;;  %v1367_v24 = vand.u32 65535, %v1364_v18  ;;  %v401_v32 = vshrl.u32 %v1364_v18, 16 }
  0xbf   : > { %v363_v20 = vsel %vm362_vm1, %v361_v16, 0  ;;  %v518_v22 = vsel %vm517_vm2, %v516_v17, 0 }
  0xc0   : > { %v365_v21 = vand.u32 31, %v363_v20  ;;  %v1369_v25 = vand.u32 31, %v518_v22  ;;  %v1373_v27 = vshrl.u32 %v363_v20, 5  ;;  %v1411_v11 = vshrl.u32 %v518_v22, 5 }
  0xc2   : > { %v366_v23 = vsub.s32 32, %v365_v21  ;;  %v368_v29 = vshll.u32 %v1191_v28, %v365_v21  ;;  %v371_v31 = vshll.u32 %v1192_v30, %v365_v21  ;;  %v374_v36 = vshll.u32 %v1193_v34, %v365_v21 }
  0xc3   : > { %v377_v39 = vshll.u32 %v1194_v37, %v365_v21  ;;  %v380_v42 = vshll.u32 %v1195_v40, %v365_v21  ;;  %v1383_v48 = vsub.s32 32, %v1369_v25  ;;  %vm383_vm3 = vcmp.lt.s32.totalorder %v1373_v27, 1 }
  0xc4   : > { %v369_v33 = vshrl.u32 %v1192_v30, %v366_v23  ;;  %v372_v35 = vshrl.u32 %v1193_v34, %v366_v23  ;;  %v375_v38 = vshrl.u32 %v1194_v37, %v366_v23  ;;  %v378_v41 = vshrl.u32 %v1195_v40, %v366_v23 }
  0xc5   : > { %v381_v44 = vshrl.u32 %v1196_v43, %v366_v23  ;;  %vm384_vm4 = vcmp.lt.s32.totalorder %v1373_v27, 2  ;;  %v367_v51 = vshrl.u32 %v1191_v28, %v366_v23  ;;  %vm386_vm5 = vcmp.lt.s32.totalorder %v1373_v27, 4 }
  0xc6   : > { %v370_v45 = vor.u32 %v369_v33, %v368_v29  ;;  %v373_v46 = vor.u32 %v372_v35, %v371_v31  ;;  %v376_v47 = vor.u32 %v375_v38, %v374_v36  ;;  %v379_v49 = vor.u32 %v378_v41, %v377_v39 }
  0xc7   : > { %v382_v50 = vor.u32 %v381_v44, %v380_v42  ;;  %vm385_vm6 = vcmp.lt.s32.totalorder %v1373_v27, 3  ;;  %v523_v56 = vshll.u32 %v1191_v28, %v1369_v25  ;;  %v524_v60 = vshrl.u32 %v1192_v30, %v1383_v48 }
  0xc8   : > { %v391_v52 = vsel %vm383_vm3, %v370_v45, %v373_v46  ;;  %v395_v53 = vsel %vm383_vm3, %v373_v46, %v376_v47  ;;  %v392_v54 = vsel %vm386_vm5, %v379_v49, 920167782  ;;  %v388_v57 = vsel %vm386_vm5, %v376_v47, 2102212464 }
  0xc9   : > { %v396_v55 = vsel %vm386_vm5, %v382_v50, 1326507024  ;;  %v393_v58 = vsel %vm385_vm6, %v376_v47, %v392_v54  ;;  %v526_v63 = vshll.u32 %v1192_v30, %v1369_v25  ;;  %v527_v0 = vshrl.u32 %v1193_v34, %v1383_v48 }
  0xca   : > { %v397_v59 = vsel %vm385_vm6, %v379_v49, %v396_v55  ;;  %v394_v61 = vsel %vm384_vm4, %v391_v52, %v393_v58  ;;  %v387_v9 = vsel %vm383_vm3, %v367_v51, %v370_v45  ;;  %v389_v10 = vsel %vm385_vm6, %v373_v46, %v388_v57 }
  0xcb   : > { %v398_v62 = vsel %vm384_vm4, %v395_v53, %v397_v59  ;;  %v424_v6 = vand.u32 65535, %v394_v61  ;;  %v425_v8 = vshrl.u32 %v394_v61, 16  ;;  %v1413_v12 = vor.u32 %v524_v60, %v523_v56 }
  0xcc   : > { %v402_v1 = vand.u32 65535, %v398_v62  ;;  %v403_v2 = vshrl.u32 %v398_v62, 16  ;;  %v1416_v15 = vor.u32 %v527_v0, %v526_v63  ;;  %v530_v16 = vshrl.u32 %v1194_v37, %v1383_v48 }
  0xcd   : > { %v427_v19 = vmul.u32 %v425_v8, %v1367_v24  ;;  %v428_v20 = vmul.u32 %v424_v6, %v401_v32  ;;  %v529_v21 = vshll.u32 %v1193_v34, %v1369_v25  ;;  %v426_v29 = vmul.u32 %v424_v6, %v1367_v24 }
  0xce   : > { %v405_v13 = vmul.u32 %v403_v2, %v1367_v24  ;;  %v406_v14 = vmul.u32 %v402_v1, %v401_v32  ;;  %v404_v17 = vmul.u32 %v402_v1, %v1367_v24  ;;  %v407_v23 = vmul.u32 %v403_v2, %v401_v32 }
  0xcf   : > { %v429_v30 = vmul.u32 %v425_v8, %v401_v32  ;;  %v430_v36 = vshll.u32 %v427_v19, 16  ;;  %v432_v39 = vshll.u32 %v428_v20, 16  ;;  %v1424_v41 = vor.u32 %v530_v16, %v529_v21 }
  0xd0   : > { %v408_v22 = vshll.u32 %v405_v13, 16  ;;  %v409_v31 = vshrl.u32 %v405_v13, 16  ;;  %v410_v33 = vshll.u32 %v406_v14, 16  ;;  %v411_v35 = vshrl.u32 %v406_v14, 16 }
  0xd1   : > { %v1197_v42 = vmov 0   ;;  %vm434_vm8 = vc.u32 %v426_v29, %v430_v36  ;;  %v436_v45 = vadd.s32 %v430_v36, %v426_v29  ;;  %v533_v34 = vshrl.u32 %v1195_v40, %v1383_v48 }
  0xd2   : > { %vm412_vm7 = vc.u32 %v404_v17, %v408_v22  ;;  %v414_v38 = vadd.s32 %v408_v22, %v404_v17  ;;  %v435_v24 = vsel %vm434_vm8, 1, %v1197_v42  ;;  %v532_v32 = vshll.u32 %v1194_v37, %v1369_v25 }
  0xd3   : > { %v413_v44 = vsel %vm412_vm7, 1, %v1197_v42  ;;  %v437_v49 = vadd.s32 %v435_v24, %v429_v30  ;;  %vm438_vm10 = vc.u32 %v436_v45, %v432_v39  ;;  %v535_v50 = vshll.u32 %v1195_v40, %v1369_v25 }
  0xd4   : > { %v415_v46 = vadd.s32 %v413_v44, %v407_v23  ;;  %vm416_vm9 = vc.u32 %v414_v38, %v410_v33  ;;  %v439_v52 = vsel %vm438_vm10, 1, %v1197_v42  ;;  %v534_v53 = vor.u32 %v533_v34, %v532_v32 }
  0xd5   : > { %v417_v47 = vsel %vm416_vm9, 1, %v1197_v42  ;;  %v536_v54 = vshrl.u32 %v1196_v43, %v1383_v48  ;;  %v431_v55 = vshrl.u32 %v427_v19, 16  ;;  %v433_v56 = vshrl.u32 %v428_v20, 16 }
  0xd6   : > { %v419_v51 = vadd.s32 %v417_v47, %v415_v46  ;;  %v1438_v57 = vadd.s32 %v436_v45, %v432_v39  ;;  %v441_v58 = vadd.s32 %v439_v52, %v437_v49  ;;  %vm538_vm11 = vcmp.lt.s32.totalorder %v1411_v11, 1 }
  0xd7   : > { %v537_v59 = vor.u32 %v536_v54, %v535_v50  ;;  %vm541_vm12 = vcmp.lt.s32.totalorder %v1411_v11, 4  ;;  %vm540_vm13 = vcmp.lt.s32.totalorder %v1411_v11, 3  ;;  %v546_v25 = vsel %vm538_vm11, %v1413_v12, %v1416_v15 }
  0xd8   : > { %v420_v37 = vadd.s32 %v419_v51, %v409_v31  ;;  %v442_v60 = vadd.s32 %v441_v58, %v431_v55  ;;  %v547_v40 = vsel %vm541_vm12, %v534_v53, 920167782  ;;  %vm539_vm14 = vcmp.lt.s32.totalorder %v1411_v11, 2 }
  0xd9   : > { %v548_v61 = vsel %vm540_vm13, %v1424_v41, %v547_v40  ;;  %v550_v62 = vsel %vm538_vm11, %v1416_v15, %v1424_v41  ;;  %v390_v63 = vsel %vm384_vm4, %v387_v9, %v389_v10  ;;  %v551_v2 = vsel %vm541_vm12, %v537_v59, 1326507024 }
  0xda   : > { %v1449_v43 = vadd.s32 %v420_v37, %v411_v35  ;;  %v443_v0 = vadd.s32 %v442_v60, %v433_v56  ;;  %v549_v1 = vsel %vm539_vm14, %v546_v25, %v548_v61  ;;  %v552_v6 = vsel %vm540_vm13, %v534_v53, %v551_v2 }
  0xdb   : > { %v555_v8 = vand.u32 65535, %v1371_v26  ;;  %v579_v13 = vand.u32 65535, %v549_v1  ;;  %v553_v27 = vsel %vm539_vm14, %v550_v62, %v552_v6  ;;  %v556_v9 = vshrl.u32 %v1371_v26, 16 }
  0xdc   : > { %vm446_vm15 = vc.u32 %v1449_v43, %v1438_v57  ;;  %v447_v14 = vadd.s32 1, %v443_v0  ;;  %v580_v10 = vshrl.u32 %v549_v1, 16  ;;  %v444_v16 = vmul.u32 %v1364_v18, %v390_v63 }
  0xdd   : > { %v557_v17 = vand.u32 65535, %v553_v27  ;;  %v558_v19 = vshrl.u32 %v553_v27, 16  ;;  %v583_v23 = vmul.u32 %v579_v13, %v556_v9  ;;  %v581_v31 = vmul.u32 %v579_v13, %v555_v8 }
  0xde   : > { %v448_v20 = vsel %vm446_vm15, %v447_v14, %v443_v0  ;;  %v582_v21 = vmul.u32 %v580_v10, %v555_v8  ;;  %v584_v33 = vmul.u32 %v580_v10, %v556_v9  ;;  %v543_v51 = vsel %vm541_vm12, %v1424_v41, 2102212464 }
  0xdf   : > { %v449_v22 = vadd.s32 %v448_v20, %v444_v16  ;;  %v560_v29 = vmul.u32 %v558_v19, %v555_v8  ;;  %v561_v30 = vmul.u32 %v557_v17, %v556_v9  ;;  %v559_v38 = vmul.u32 %v557_v17, %v555_v8 }
  0xe0   : > { %v585_v35 = vshll.u32 %v582_v21, 16  ;;  %v562_v39 = vmul.u32 %v558_v19, %v556_v9  ;;  %v587_v34 = vshll.u32 %v583_v23, 16  ;;  %v522_v53 = vshrl.u32 %v1191_v28, %v1383_v48 }
  0xe1   : > { %v450_v36 = vadd.s32 536870912, %v449_v22  ;;  %v563_v44 = vshll.u32 %v560_v29, 16  ;;  %v565_v45 = vshll.u32 %v561_v30, 16  ;;  %v564_v58 = vshrl.u32 %v560_v29, 16 }
  0xe2   : > { %vm589_vm1 = vc.u32 %v581_v31, %v585_v35  ;;  %v591_v46 = vadd.s32 %v585_v35, %v581_v31  ;;  %v542_v60 = vsel %vm538_vm11, %v522_v53, %v1413_v12  ;;  %v544_v41 = vsel %vm540_vm13, %v1416_v15, %v543_v51 }
  0xe3   : > { %v1474_v18 = vshrl.u32 %v450_v36, 30  ;;  %vm567_vm2 = vc.u32 %v559_v38, %v563_v44  ;;  %v569_v24 = vadd.s32 %v563_v44, %v559_v38  ;;  %v590_v32 = vsel %vm589_vm1, 1, %v1197_v42 }
  0xe4   : > { %v568_v47 = vsel %vm567_vm2, 1, %v1197_v42  ;;  %v592_v49 = vadd.s32 %v590_v32, %v584_v33  ;;  %vm593_vm3 = vc.u32 %v591_v46, %v587_v34  ;;  %v586_v25 = vshrl.u32 %v582_v21, 16 }
  0xe5   : > { %v452_v50 = vshll.u32 %v1474_v18, 30  ;;  %v570_v52 = vadd.s32 %v568_v47, %v562_v39  ;;  %vm571_vm4 = vc.u32 %v569_v24, %v565_v45  ;;  %v594_v55 = vsel %vm593_vm3, 1, %v1197_v42 }
  0xe6   : > { %v572_v54 = vsel %vm571_vm4, 1, %v1197_v42  ;;  %v596_v59 = vadd.s32 %v594_v55, %v592_v49  ;;  %v566_v28 = vshrl.u32 %v561_v30, 16  ;;  %v588_v61 = vshrl.u32 %v583_v23, 16 }
  0xe7   : > { %v453_v56 = vsub.s32 %v449_v22, %v452_v50  ;;  %v574_v37 = vadd.s32 %v572_v54, %v570_v52  ;;  %v595_v0 = vadd.s32 %v591_v46, %v587_v34  ;;  %v545_v2 = vsel %vm539_vm14, %v542_v60, %v544_v41 }
  0xe8   : > { %v597_v62 = vadd.s32 %v596_v59, %v586_v25  ;;  %v599_v15 = vmul.u32 %v1371_v26, %v545_v2  ;;  %v445_v9 = vadd.s32 %v1438_v57, %v1449_v43  ;;  %vm353_vm9 = vcmp.lt.s32.totalorder %v1352_v3, 0 }
  0xe9   : > { %vm454_vm5 = vcmp.lt.s32.totalorder %v453_v56, 0  ;;  %v455_v40 = vsub.s32 0, %v453_v56  ;;  %v575_v48 = vadd.s32 %v574_v37, %v564_v58  ;;  %vm1503_vm10 = vcmp.le.f32.partialorder %v351_v5, 0.7853982 }
  0xea   : > { %v598_v6 = vadd.s32 %v597_v62, %v588_v61  ;;  %v475_v34 = vsub.s32 4, %v1474_v18  ;;  %vm508_vm12 = vcmp.lt.s32.totalorder %v1354_v4, 0  ;;  %vm1519_vm13 = vcmp.le.f32.partialorder %v506_v7, 0.7853982 }
  0xeb   : > { %v456_v42 = vsel %vm454_vm5, %v455_v40, %v453_v56  ;;  %v576_v63 = vadd.s32 %v575_v48, %v566_v28  ;;  %vm494_vm2 = vweird.f32 %v1352_v3  ;;  %vm673_vm3 = vcmask 1043456  }
  0xec   : > { %v457_v1 = vclz %v456_v42  ;;  %v602_v8 = vadd.s32 1, %v598_v6  ;;  %v476_v5 = vsel %vm353_vm9, %v475_v34, %v1474_v18 }
  0xed   : > { %vm601_vm6 = vc.u32 %v576_v63, %v595_v0  ;;  %v600_v49 = vadd.s32 %v595_v0, %v576_v63  ;;  %v478_v37 = vsel %vm1503_vm10, 0, %v476_v5 }
  0xee   : > { %v864_v12 = vadd.s32 4294967294, %v457_v1  ;;  %v603_v13 = vsel %vm601_vm6, %v602_v8, %v598_v6  ;;  %v495_v48 = vadd.s32 3, %v478_v37 }
  0xef   : > { %v604_v27 = vadd.s32 %v603_v13, %v599_v15  ;;  %v972_v13 = vld [vmem:[%s261_s10] ss:$0 sm:$0xff] }
  0xf0   : > { %vm865_vm7 = vcmp.lt.s32.totalorder %v864_v12, 0  ;;  %v496_v2 = vand.u32 3, %v495_v48 }
  0xf1   : > { %v460_v14 = vsel %vm865_vm7, 0, %v864_v12  ;;  %v605_v17 = vadd.s32 536870912, %v604_v27  ;;  %vm649_vm7 = vweird.f32 %v1354_v4 }
  0xf2   : > { %v461_v10 = vsub.s32 32, %v460_v14  ;;  %v465_v16 = vsub.s32 4294967266, %v460_v14  ;;  %v462_v19 = vshll.u32 %v453_v56, %v460_v14  ;;  %vm498_vm14 = vcmp.eq.s32.totalorder %v496_v2, 0 }
  0xf3   : > { %v1497_v21 = vshrl.u32 %v605_v17, 30  ;;  %vm501_vm15 = vcmp.eq.s32.totalorder %v496_v2, 2  ;;  %vm497_vm1 = vcmp.lt.s32.totalorder %v496_v2, 2 }
  0xf4   : > { %v463_v20 = vshrl.u32 %v445_v9, %v461_v10  ;;  %v466_v11 = vadd.s32 127, %v465_v16  ;;  %v661_v10 = vld [vmem:[#allocation8] sm:$0xff] }
  0xf5   : > { %v607_v29 = vshll.u32 %v1497_v21, 30  ;;  %v630_v16 = vsub.s32 4, %v1497_v21 }
  0xf6   : > { %v464_v23 = vor.u32 %v463_v20, %v462_v19  ;;  %v467_v22 = vshll.u32 %v466_v11, 23 }
  0xf7   : > { %v608_v30 = vsub.s32 %v604_v27, %v607_v29 }
  0xf8   : > { %v468_v26 = vor.u32 4788187, %v467_v22  ;;  %v471_v33 = vcvt.s32.f32 %v464_v23  ;;  %v666_v23 = vmul.f32 %v972_v13, %v661_v10 }
  0xf9   : > { %vm609_vm8 = vcmp.lt.s32.totalorder %v608_v30, 0  ;;  %v610_v35 = vsub.s32 0, %v608_v30 }
  0xfa   : > { %v469_v31 = vand.u32 2147483647, %v468_v26 }
  0xfb   : > { %v611_v57 = vsel %vm609_vm8, %v610_v35, %v608_v30 }
  0xfc   : > { %v472_v36 = vmul.f32 %v471_v33, %v469_v31  ;;  %v612_v38 = vclz %v611_v57  ;;  %v667_v57 = vpack.c.bf16 %v666_v23, %v666_v23 }
  0xfe   : > { %v473_v43 = vxor.u32 2147483648, %v472_v36  ;;  %v867_v45 = vadd.s32 4294967294, %v612_v38 }
 0x100   : > { %v474_v44 = vsel %vm353_vm9, %v473_v43, %v472_v36  ;;  %vm868_vm11 = vcmp.lt.s32.totalorder %v867_v45, 0 }
 0x101   : > { %v477_v46 = vsel %vm1503_vm10, %v1352_v3, %v474_v44  ;;  %v615_v32 = vsel %vm868_vm11, 0, %v867_v45 }
 0x102   : > { %v479_v24 = vmul.f32 %v477_v46, %v477_v46  ;;  %v616_v50 = vsub.s32 32, %v615_v32  ;;  %v620_v51 = vsub.s32 4294967266, %v615_v32  ;;  %v617_v54 = vshll.u32 %v608_v30, %v615_v32 }
 0x103   : > { %v631_v30 = vsel %vm508_vm12, %v630_v16, %v1497_v21 }
 0x104   : > { %v487_v47 = vmul.f32 -0.00019511016, %v479_v24  ;;  %v480_v52 = vmul.f32 -0.001358992, %v479_v24  ;;  %v618_v55 = vshrl.u32 %v600_v49, %v616_v50  ;;  %v621_v56 = vadd.s32 127, %v620_v51 }
 0x105   : > { %v633_v43 = vsel %vm1519_vm13, 0, %v631_v30 }
 0x106   : > { %v488_v53 = vadd.f32 0.008332121, %v487_v47  ;;  %v481_v58 = vadd.f32 0.041655596, %v480_v52  ;;  %v619_v60 = vor.u32 %v618_v55, %v617_v54  ;;  %v622_v41 = vshll.u32 %v621_v56, 23 }
 0x107   : > { %v650_v45 = vadd.s32 3, %v633_v43 }
 0x108   : > { %v489_v59 = vmul.f32 %v488_v53, %v479_v24  ;;  %v482_v25 = vmul.f32 %v481_v58, %v479_v24  ;;  %v623_v28 = vor.u32 4788187, %v622_v41  ;;  %v626_v42 = vcvt.s32.f32 %v619_v60 }
 0x109   : > { %v651_v32 = vand.u32 3, %v650_v45 }
 0x10a   : > { %v490_v40 = vadd.f32 -0.16666654, %v489_v59  ;;  %v483_v61 = vadd.f32 -0.4999988, %v482_v25  ;;  %v624_v18 = vand.u32 2147483647, %v623_v28 }
 0x10b   : > { %vm653_vm4 = vcmp.eq.s32.totalorder %v651_v32, 0  ;;  %vm656_vm5 = vcmp.eq.s32.totalorder %v651_v32, 2  ;;  %vm652_vm6 = vcmp.lt.s32.totalorder %v651_v32, 2 }
 0x10c   : > { %v491_v62 = vmul.f32 %v490_v40, %v479_v24  ;;  %v484_v63 = vmul.f32 %v483_v61, %v479_v24  ;;  %v627_v1 = vmul.f32 %v626_v42, %v624_v18 }
 0x10e   : > { %v492_v0 = vadd.f32 1.0, %v491_v62  ;;  %v485_v6 = vadd.f32 1.0, %v484_v63  ;;  %v628_v8 = vxor.u32 2147483648, %v627_v1 }
 0x110   : > { %v493_v12 = vmul.f32 %v492_v0, %v477_v46  ;;  %v502_v15 = vxor.u32 2147483648, %v485_v6  ;;  %v629_v9 = vsel %vm508_vm12, %v628_v8, %v627_v1 }
 0x111   : > { %v632_v17 = vsel %vm1519_vm13, %v1354_v4, %v629_v9 }
 0x112   : > { %v499_v14 = vxor.u32 2147483648, %v493_v12  ;;  %v634_v19 = vmul.f32 %v632_v17, %v632_v17  ;;  %v503_v11 = vsel %vm501_vm15, %v502_v15, %v493_v12 }
 0x114   : > { %v500_v20 = vsel %vm498_vm14, %v485_v6, %v499_v14  ;;  %v642_v22 = vmul.f32 -0.00019511016, %v634_v19  ;;  %v635_v26 = vmul.f32 -0.001358992, %v634_v19 }
 0x115   : > { %v504_v7 = vsel %vm497_vm1, %v500_v20, %v503_v11 }
 0x116   : > { %v505_v29 = vsel %vm494_vm2, nan, %v504_v7  ;;  %v643_v33 = vadd.f32 0.008332121, %v642_v22  ;;  %v636_v35 = vadd.f32 0.041655596, %v635_v26 }
 0x117   : > { %v668_v31 = vpack.c.bf16 %v505_v29, %v505_v29 }
 0x118   : > { %v644_v3 = vmul.f32 %v643_v33, %v634_v19  ;;  %v637_v38 = vmul.f32 %v636_v35, %v634_v19 }
 0x119   : > { %v675_v36 = vsel %vm673_vm3, %v668_v31, 0 }
 0x11a   : > { %687 = vmatpush.bf16.msra.mxu2 %v675_v36  ;;  %v645_v39 = vadd.f32 -0.16666654, %v644_v3  ;;  %v638_v44 = vadd.f32 -0.4999988, %v637_v38 }
 0x11c   : > { %v646_v34 = vmul.f32 %v645_v39, %v634_v19  ;;  %v639_v46 = vmul.f32 %v638_v44, %v634_v19 }
 0x11d   : > { %869 = vmatmul.msk.bf16.vlgmr.msra.gmra.mxu2 %vm307_vm0, %v667_v57 }
 0x11e   : > { %v647_v21 = vadd.f32 1.0, %v646_v34  ;;  %v640_v24 = vadd.f32 1.0, %v639_v46 }
 0x120   : > { %v648_v47 = vmul.f32 %v647_v21, %v632_v17  ;;  %v657_v49 = vxor.u32 2147483648, %v640_v24 }
 0x122   : > { %v654_v50 = vxor.u32 2147483648, %v648_v47  ;;  %v658_v5 = vsel %vm656_vm5, %v657_v49, %v648_v47 }
 0x124   : > { %v655_v51 = vsel %vm653_vm4, %v640_v24, %v654_v50 }
 0x125   : > { %v659_v52 = vsel %vm652_vm6, %v655_v51, %v658_v5 }
 0x126   : > { %v660_v53 = vsel %vm649_vm7, nan, %v659_v52 }
 0x127   : > { %v669_v54 = vpack.c.bf16 %v660_v53, %v660_v53 }
 0x129   : > { %v678_v55 = vsel %vm673_vm3, %v669_v54, 0 }
 0x12a   : > { %700 = vmatpush.bf16.msra.mxu3 %v678_v55 }
 0x12d   : > { %870 = vmatmul.msk.bf16.vlgmr.msra.gmra.mxu3 %vm307_vm0, %v667_v57 }
 0x1a0   : > { %v689_v56 = vpop.f32.mrf.mxu2 }
 0x1a1   : > { %706 = vst [vmem:[%s300_s23] sm:$0xff] %v689_v56 }
 0x1a8   : > { %v691_v58 = vpop.f32.mrf.mxu2 }
 0x1b0   : > { %v702_v4 = vpop.f32.mrf.mxu3 }
 0x1b1   : > { %707 = vst [vmem:[%s300_s23 + $0x8] sm:$0xff] %v702_v4 }
 0x1b2   : > { %1120 = shalt.err (!%p1117_p0)
}
 0x1b3   : > { %889 = dma.vmem_to_hbm [thread:$0]  (%p1302_p7), %s725_s5, 256, %s727_s6, %s709_s7  }
 0x1b8   : > { %v704_v37 = vpop.f32.mrf.mxu3 }
 0x1b9 PF: > { %s738_s12 = sand.u32 1, %s1167_s15   ;;  %p906_p3 = pnand %p853_p9, %p1268_p6 }
 0x1ba   : > { %s739_s3 = scalar_lea.sflag [#allocation4], %s738_s12 }
 0x1bb   : > { %p907_p5 = pneg %p906_p3 }
 0x1bd   : > { %1162 = dma.done.wait (%p907_p5), %s739_s3, 256  }
 0x1be   : > { %1164 = vsyncadd (%p907_p5), %s739_s3, 4294967040  ;;  %s24_s20 = sadd.s32 1, %s1187_s20   ;;  %s1602_s25 = sld [smem:[#allocation16_spill]] }
 0x1bf   : > { %p21_p10 = scmp.ge.s32.totalorder %s24_s20, 4   ;;  %s1603_s17 = sld [smem:[#allocation18_spill]] }
 0x1c0   : > { %s1604_s13 = sld [smem:[#allocation17_spill]]  ;;  %s1605_s15 = smov %s1171_s16 }
 0x1c1   : > { %s1607_s18 = smov %s1183_s19 }
 0x1c2   :  { %23 = sbr.rel (!%p21_p10) target bundleno = 12 (0xc), region = 103 }
 0x1c4   : > { %s1606_s16 = smov %s1602_s25 }
 0x1c6   : > { %s1608_s19 = smov %s1604_s13 }
 0x1c7   :  { %745 = vsyncpa [#allocation3], 1 }
 0x1c8   :  { %747 = vsyncpa [#allocation3 + $0x1], 1 }
 0x1c9   :  { %748 = vsyncpa [#allocation6], 1 }
 0x1ca   :  { %750 = vsyncpa [#allocation6 + $0x1], 1 }
 0x1cb   :  { %751 = vsyncpa [#allocation9], 1 }
 0x1cc   :  { %752 = vsyncpa [#allocation4], 1 }
 0x1cd   :  { %754 = vsyncpa [#allocation4 + $0x1], 1 }

</bundles_post_ra>
